<compile_context>
chip_gen: v5e
topology: v5e:2x2
jax: 0.10.0
libtpu: 0.0.40
codegen_flags: <defaults>
</compile_context>

<pallas_src>
import jax
import jax.numpy as jnp
from jax.experimental import pallas as pl
from jax.experimental.pallas import tpu as pltpu

LANES = 128      # lane width (last dim of every tile)
TM_MAX = 2048    # rows per grid step: (2048,128) f32 = 1 MiB per input block


def _cdiv(a, b):
    return (a + b - 1) // b


def _round_up(x, m):
    return ((x + m - 1) // m) * m


def _num_core_split():
    """2-way TensorCore split only on v7x (2 TCs/chip); 1 everywhere else.

    On single-TC chips a 2-way split is pure overhead (duplicate tiles,
    index clamps, extra accumulator block), so it is disabled there.
    """
    try:
        kind = jax.devices()[0].device_kind.lower()
    except Exception:
        return 1
    return 2 if ("v7" in kind or "tpu7" in kind) else 1


def _make_kernel(rows, tm, steps_per_core, needs_mask):
    """Build the reduction body; closes over static tiling parameters."""

    def accumulate(pred_ref, lab_ref, out_ref, valid):
        x = pred_ref[...].astype(jnp.float32)
        lab = lab_ref[...]                       # native dtype (f32/uint8/...)

        pos_mask = lab == 1
        neg_mask = lab == 0
        if valid is not None:
            # Ragged tile: rows >= `rows` hold garbage VMEM; mask them out and
            # keep the garbage out of exp/log so it cannot produce NaN/Inf.
            pos_mask = jnp.logical_and(valid, pos_mask)
            neg_mask = jnp.logical_and(valid, neg_mask)
            x = jnp.where(valid, x, 0.0)

        # Numerically-stable form of the torch reference:
        #   loss_val = x*(labels_pos - (x>=0)) - log(1 + exp(x - 2*x*(x>=0)))
        # with exp argument == -|x|; per element:
        #   -labels_pos*loss_val = sp - min(x, 0)
        #   -labels_neg*loss_val = sp + max(x, 0)
        sp = jnp.log(1.0 + jnp.exp(-jnp.abs(x)))
        lp_c = jnp.where(pos_mask, sp - jnp.minimum(x, 0.0), 0.0)
        ln_c = jnp.where(neg_mask, sp + jnp.maximum(x, 0.0), 0.0)

        def fold(t):
            # (tm, LANES) -> (8, LANES): pure VPU vreg adds, no cross-lane XLU.
            return jnp.sum(t.reshape(tm // 8, 8, LANES), axis=0)

        out_ref[0] += fold(pos_mask.astype(jnp.float32))   # running num_pos
        out_ref[1] += fold(neg_mask.astype(jnp.float32))   # running num_neg
        out_ref[2] += fold(lp_c)                            # running loss_pos
        out_ref[3] += fold(ln_c)                            # running loss_neg

    def kernel(pred_ref, lab_ref, out_ref):
        c = pl.program_id(0)        # core-split index
        i = pl.program_id(1)        # row-tile index within this core

        # out_ref is the per-core (4, 8, 128) accumulator; its block index only
        # depends on c, so it stays VMEM-resident across the whole i axis.
        @pl.when(i == 0)
        def _():
            out_ref[...] = jnp.zeros_like(out_ref)

        if not needs_mask:
            accumulate(pred_ref, lab_ref, out_ref, None)
        else:
            row_start = (c * steps_per_core + i) * tm

            # Fast path: full, in-bounds tile (the common case) -- no masking.
            @pl.when(row_start + tm <= rows)
            def _():
                accumulate(pred_ref, lab_ref, out_ref, None)

            # Slow path: the single ragged tile.  Fully-out-of-bounds duplicate
            # tiles (only possible with the 2-way core split) fall through both
            # branches and are skipped entirely.
            @pl.when(jnp.logical_and(row_start < rows, row_start + tm > rows))
            def _():
                k = rows - row_start
                row_ids = jax.lax.broadcasted_iota(jnp.int32, (tm, 1), 0)
                accumulate(pred_ref, lab_ref, out_ref, row_ids < k)

    return kernel


def _partial_sums(pred2d, lab2d, rows, tm, num_core_split):
    """Per-core partial sums, shape (num_cores, 4, 8, LANES):
       [:,0]=num_pos, [:,1]=num_neg, [:,2]=loss_pos, [:,3]=loss_neg."""
    nb = _cdiv(rows, tm)                        # total row tiles
    num_cores = max(1, min(num_core_split, nb))
    steps = _cdiv(nb, num_cores)                # row tiles per core
    has_dup = num_cores * steps != nb           # some (c, i) map past last tile
    needs_mask = (nb * tm != rows) or has_dup

    def in_map(c, i):
        blk = c * steps + i
        if has_dup:
            blk = jnp.minimum(blk, nb - 1)      # keep DMA in bounds; skipped in-kernel
        return (blk, 0)

    kernel = _make_kernel(rows, tm, steps, needs_mask)

    if num_cores == 2:
        # v7x: actually shard the leading axis across the two TensorCores.
        lead_sem = getattr(pltpu, "CORE_PARALLEL", "parallel")
        sems = (lead_sem, "arbitrary")
    else:
        sems = ("arbitrary", "arbitrary")

    return pl.pallas_call(
        kernel,
        out_shape=jax.ShapeDtypeStruct((num_cores, 4, 8, LANES), jnp.float32),
        grid_spec=pltpu.PrefetchScalarGridSpec(
            num_scalar_prefetch=0,
            grid=(num_cores, steps),
            in_specs=[
                pl.BlockSpec((tm, LANES), in_map),   # preds, native dtype
                pl.BlockSpec((tm, LANES), in_map),   # labels, native dtype
            ],
            out_specs=pl.BlockSpec((None, 4, 8, LANES),
                                   lambda c, i: (c, 0, 0, 0)),
        ),
        compiler_params=pltpu.CompilerParams(
            dimension_semantics=sems,
            # ~4-5 MiB of pipeline buffers at tm=2048; give explicit headroom
            # (v5e default scoped limit is 16 MiB).
            vmem_limit_bytes=32 * 1024 * 1024,
        ),
    )(pred2d, lab2d)


def criterion_loss(preds, target, ignore_index=255, tile_rows=None):
    """Pallas equivalent of Criterion.forward / balanced_binary_cross_entropy.

    preds:  (N, 1, H, W) logits; any float dtype (bf16 preferred if the model
            allows -- the kernel upcasts in-register, and narrower inputs cut
            HBM bytes on this bandwidth-bound reduction).
    target: (N, H, W) labels in {0, 1, ignore_index}; any dtype (uint8
            preferred), passed through un-upcast.
    Returns scalar float32 loss.
    """
    assert target.ndim == 3
    # torch.unsqueeze(label, 1) gives (N,1,H,W); broadcasting with preds
    # (N,1,H,W) is purely elementwise, so flattening both is equivalent.
    preds_flat = preds.reshape(-1)
    target_flat = target.reshape(-1)
    n = preds_flat.shape[0]
    assert target_flat.shape[0] == n

    # Pad (a copy) only when not lane aligned; padded labels get value 2,
    # which is representable in every integer/float label dtype and is
    # neither positive (==1) nor negative (==0), so padding contributes 0.
    if n % LANES != 0:
        pad = LANES - n % LANES
        preds_flat = jnp.pad(preds_flat, (0, pad))
        if target_flat.dtype == jnp.bool_:
            target_flat = target_flat.astype(jnp.uint8)
        target_flat = jnp.pad(target_flat, (0, pad), constant_values=2)

    rows = preds_flat.shape[0] // LANES
    pred2d = preds_flat.reshape(rows, LANES)
    lab2d = target_flat.reshape(rows, LANES)

    # Row-tile size: multiple of 32 (keeps uint8 label blocks tile-aligned),
    # capped at TM_MAX (tile_rows override is for testing the multi-tile path).
    tm_cap = TM_MAX if tile_rows is None else tile_rows
    tm = min(tm_cap, _round_up(rows, 32))
    tm = _round_up(tm, 32)

    partial = _partial_sums(pred2d, lab2d, rows, tm, _num_core_split())
    sums = jnp.sum(partial, axis=(0, 2, 3))             # (4,)
    num_pos, num_neg = sums[0], sums[1]
    loss_pos, loss_neg = sums[2], sums[3]
    num_total = num_pos + num_neg
    # NOTE: matches torch reference semantics, incl. NaN if every pixel is ignored.
    return (num_neg / num_total) * loss_pos + (num_pos / num_total) * loss_neg


class Criterion:
    """Thin wrapper mirroring the PyTorch module's interface."""

    def __init__(self, ignore_index=255):
        self.ignore_index = ignore_index

    def __call__(self, preds, target):
        return criterion_loss(preds, target, self.ignore_index)


def _reference_loss(preds, target):
    """Pure-JAX reference mirroring the torch code (for sanity check)."""
    label = target[:, None, :, :].astype(jnp.float32)
    output = preds.astype(jnp.float32)
    labels_pos = (label == 1.0).astype(jnp.float32)
    labels_neg = (label == 0.0).astype(jnp.float32)
    num_pos = jnp.sum(labels_pos)
    num_neg = jnp.sum(labels_neg)
    num_total = num_pos + num_neg
    gz = (output >= 0.0).astype(jnp.float32)
    loss_val = output * (labels_pos - gz) - jnp.log(
        1.0 + jnp.exp(output - 2.0 * output * gz))
    loss_pos = -jnp.sum(labels_pos * loss_val)
    loss_neg = -jnp.sum(labels_neg * loss_val)
    return (num_neg / num_total) * loss_pos + (num_pos / num_total) * loss_neg


if __name__ == "__main__":
    key = jax.random.PRNGKey(0)
    k1, k2, k3, k4, k5, k6 = jax.random.split(key, 6)

    loss_fn = jax.jit(criterion_loss, static_argnames=("ignore_index", "tile_rows"))

    # Test 1: small NCHW input, float32 labels (exactly the torch module's usage).
    N, H, W = 2, 16, 16
    preds = jax.random.normal(k1, (N, 1, H, W), dtype=jnp.float32) * 3.0
    target = (jax.random.uniform(k2, (N, H, W)) > 0.5).astype(jnp.float32)
    target = target.at[0, 0, :4].set(255.0)            # a few ignored pixels
    loss = jax.block_until_ready(loss_fn(preds, target))
    ref = jax.block_until_ready(_reference_loss(preds, target))
    assert jnp.allclose(loss, ref, rtol=1e-5, atol=1e-3), (loss, ref)

    # Test 2: bf16 preds + uint8 labels, forced small tile (tile_rows=64) so the
    # multi-tile grid, the fast/ragged-tile split, and the narrow-dtype path
    # are all exercised at a small shape (rows=250 -> 3 full tiles + 1 partial).
    N2, H2, W2 = 2, 100, 160
    preds2 = (jax.random.normal(k3, (N2, 1, H2, W2), dtype=jnp.float32) * 3.0
              ).astype(jnp.bfloat16)
    target2 = (jax.random.uniform(k4, (N2, H2, W2)) > 0.5).astype(jnp.uint8)
    target2 = target2.at[1, :3, :].set(255)            # some ignored pixels
    loss2 = jax.block_until_ready(loss_fn(preds2, target2, tile_rows=64))
    ref2 = jax.block_until_ready(_reference_loss(preds2, target2))
    assert jnp.allclose(loss2, ref2, rtol=1e-3, atol=1e-2), (loss2, ref2)

    # Test 3: non-lane-aligned element count -> exercises the padding path.
    N3, H3, W3 = 1, 10, 13
    preds3 = jax.random.normal(k5, (N3, 1, H3, W3), dtype=jnp.float32) * 3.0
    target3 = (jax.random.uniform(k6, (N3, H3, W3)) > 0.5).astype(jnp.uint8)
    loss3 = jax.block_until_ready(loss_fn(preds3, target3))
    ref3 = jax.block_until_ready(_reference_loss(preds3, target3))
    assert jnp.allclose(loss3, ref3, rtol=1e-5, atol=1e-3), (loss3, ref3)

    print("KERNEL_OK")
</pallas_src>

<mosaic_0001>
module attributes {stable_mosaic.version = 11 : i64} {
  func.func @kernel(%arg0: i32, %arg1: i32, %arg2: memref<32x128xf32, #tpu.memory_space<vmem>>, %arg3: memref<32x128xf32, #tpu.memory_space<vmem>>, %arg4: memref<1x4x8x128xf32, #tpu.memory_space<vmem>>) attributes {dimension_semantics = [#tpu.dimension_semantics<arbitrary>, #tpu.dimension_semantics<arbitrary>], iteration_bounds = array<i64: 1, 1>, scalar_prefetch = 0 : i64, scratch_operands = 0 : i64, tpu.core_type = #tpu.core_type<tc>, window_params = [{transform_indices = @transform_0, window_bounds = array<i64: 32, 128>}, {transform_indices = @transform_1, window_bounds = array<i64: 32, 128>}, {transform_indices = @transform_2, window_bounds = array<i64: 1, 4, 8, 128>}]} {
    %c0_i32 = arith.constant 0 : i32
    %0 = arith.cmpi eq, %arg1, %c0_i32 : i32
    %1 = arith.extui %0 : i1 to i32
    %c0_i32_0 = arith.constant 0 : i32
    %2 = arith.cmpi ne, %1, %c0_i32_0 : i32
    scf.if %2 {
      %cst = arith.constant 0.000000e+00 : f32
      %16 = vector.broadcast %cst : f32 to vector<4x8x128xf32>
      %c0 = arith.constant 0 : index
      %c0_7 = arith.constant 0 : index
      %c0_8 = arith.constant 0 : index
      %c0_9 = arith.constant 0 : index
      %17 = vector.load %arg4[%c0, %c0_7, %c0_8, %c0_9] : memref<1x4x8x128xf32, #tpu.memory_space<vmem>>, vector<1x4x8x128xf32>
      %18 = vector.shape_cast %17 : vector<1x4x8x128xf32> to vector<4x8x128xf32>
      %19 = vector.shape_cast %16 : vector<4x8x128xf32> to vector<1x4x8x128xf32>
      tpu.vector_store %arg4[%c0, %c0_7, %c0_8, %c0_9], %19 {strides = array<i32>} : memref<1x4x8x128xf32, #tpu.memory_space<vmem>>, vector<1x4x8x128xf32>,
    } else {
    }
    %c1_i32 = arith.constant 1 : i32
    %3 = arith.muli %arg0, %c1_i32 : i32
    %4 = arith.addi %3, %arg1 : i32
    %c32_i32 = arith.constant 32 : i32
    %5 = arith.muli %4, %c32_i32 : i32
    %c32_i32_1 = arith.constant 32 : i32
    %6 = arith.addi %5, %c32_i32_1 : i32
    %c4_i32 = arith.constant 4 : i32
    %7 = arith.cmpi sle, %6, %c4_i32 : i32
    %8 = arith.extui %7 : i1 to i32
    %c0_i32_2 = arith.constant 0 : i32
    %9 = arith.cmpi ne, %8, %c0_i32_2 : i32
    scf.if %9 {
      %c0 = arith.constant 0 : index
      %c0_7 = arith.constant 0 : index
      %16 = vector.load %arg2[%c0, %c0_7] : memref<32x128xf32, #tpu.memory_space<vmem>>, vector<32x128xf32>
      %c0_8 = arith.constant 0 : index
      %c0_9 = arith.constant 0 : index
      %17 = vector.load %arg3[%c0_8, %c0_9] : memref<32x128xf32, #tpu.memory_space<vmem>>, vector<32x128xf32>
      %cst = arith.constant 1.000000e+00 : f32
      %18 = vector.broadcast %cst : f32 to vector<32x128xf32>
      %19 = arith.cmpf oeq, %17, %18 : vector<32x128xf32>
      %cst_10 = arith.constant 0.000000e+00 : f32
      %20 = vector.broadcast %cst_10 : f32 to vector<32x128xf32>
      %21 = arith.cmpf oeq, %17, %20 : vector<32x128xf32>
      %22 = math.absf %16 : vector<32x128xf32>
      %cst_11 = arith.constant 0.000000e+00 : f32
      %23 = vector.broadcast %cst_11 : f32 to vector<32x128xf32>
      %24 = arith.subf %23, %22 : vector<32x128xf32>
      %25 = math.exp %24 : vector<32x128xf32>
      %cst_12 = arith.constant 1.000000e+00 : f32
      %26 = vector.broadcast %cst_12 : f32 to vector<32x128xf32>
      %27 = arith.addf %26, %25 : vector<32x128xf32>
      %28 = math.log %27 : vector<32x128xf32>
      %cst_13 = arith.constant 0.000000e+00 : f32
      %29 = vector.broadcast %cst_13 : f32 to vector<32x128xf32>
      %30 = arith.minimumf %16, %29 : vector<32x128xf32>
      %31 = arith.subf %28, %30 : vector<32x128xf32>
      %cst_14 = arith.constant 0.000000e+00 : f32
      %32 = vector.broadcast %cst_14 : f32 to vector<32x128xf32>
      %33 = arith.select %19, %31, %32 : vector<32x128xi1>, vector<32x128xf32>
      %cst_15 = arith.constant 0.000000e+00 : f32
      %34 = vector.broadcast %cst_15 : f32 to vector<32x128xf32>
      %35 = arith.maximumf %16, %34 : vector<32x128xf32>
      %36 = arith.addf %28, %35 : vector<32x128xf32>
      %cst_16 = arith.constant 0.000000e+00 : f32
      %37 = vector.broadcast %cst_16 : f32 to vector<32x128xf32>
      %38 = arith.select %21, %36, %37 : vector<32x128xi1>, vector<32x128xf32>
      %c0_17 = arith.constant 0 : index
      %c0_18 = arith.constant 0 : index
      %c0_19 = arith.constant 0 : index
      %c0_20 = arith.constant 0 : index
      %39 = vector.load %arg4[%c0_17, %c0_18, %c0_19, %c0_20] : memref<1x4x8x128xf32, #tpu.memory_space<vmem>>, vector<1x1x8x128xf32>
      %40 = vector.shape_cast %39 : vector<1x1x8x128xf32> to vector<8x128xf32>
      %41 = arith.extui %19 : vector<32x128xi1> to vector<32x128xi32>
      %42 = arith.sitofp %41 : vector<32x128xi32> to vector<32x128xf32>
      %43 = vector.shape_cast %42 : vector<32x128xf32> to vector<4x8x128xf32>
      %cst_21 = arith.constant dense<0.000000e+00> : vector<8x128xf32>
      %44 = vector.multi_reduction <add>, %43, %cst_21 [0] : vector<4x8x128xf32> to vector<8x128xf32>
      %45 = arith.addf %40, %44 : vector<8x128xf32>
      %c0_22 = arith.constant 0 : index
      %c0_23 = arith.constant 0 : index
      %c0_24 = arith.constant 0 : index
      %c0_25 = arith.constant 0 : index
      %46 = vector.load %arg4[%c0_22, %c0_23, %c0_24, %c0_25] : memref<1x4x8x128xf32, #tpu.memory_space<vmem>>, vector<1x1x8x128xf32>
      %47 = vector.shape_cast %46 : vector<1x1x8x128xf32> to vector<8x128xf32>
      %48 = vector.shape_cast %45 : vector<8x128xf32> to vector<1x1x8x128xf32>
      tpu.vector_store %arg4[%c0_22, %c0_23, %c0_24, %c0_25], %48 {strides = array<i32>} : memref<1x4x8x128xf32, #tpu.memory_space<vmem>>, vector<1x1x8x128xf32>,
      %c0_26 = arith.constant 0 : index
      %c1 = arith.constant 1 : index
      %c0_27 = arith.constant 0 : index
      %c0_28 = arith.constant 0 : index
      %49 = vector.load %arg4[%c0_26, %c1, %c0_27, %c0_28] : memref<1x4x8x128xf32, #tpu.memory_space<vmem>>, vector<1x1x8x128xf32>
      %50 = vector.shape_cast %49 : vector<1x1x8x128xf32> to vector<8x128xf32>
      %51 = arith.extui %21 : vector<32x128xi1> to vector<32x128xi32>
      %52 = arith.sitofp %51 : vector<32x128xi32> to vector<32x128xf32>
      %53 = vector.shape_cast %52 : vector<32x128xf32> to vector<4x8x128xf32>
      %cst_29 = arith.constant dense<0.000000e+00> : vector<8x128xf32>
      %54 = vector.multi_reduction <add>, %53, %cst_29 [0] : vector<4x8x128xf32> to vector<8x128xf32>
      %55 = arith.addf %50, %54 : vector<8x128xf32>
      %c0_30 = arith.constant 0 : index
      %c1_31 = arith.constant 1 : index
      %c0_32 = arith.constant 0 : index
      %c0_33 = arith.constant 0 : index
      %56 = vector.load %arg4[%c0_30, %c1_31, %c0_32, %c0_33] : memref<1x4x8x128xf32, #tpu.memory_space<vmem>>, vector<1x1x8x128xf32>
      %57 = vector.shape_cast %56 : vector<1x1x8x128xf32> to vector<8x128xf32>
      %58 = vector.shape_cast %55 : vector<8x128xf32> to vector<1x1x8x128xf32>
      tpu.vector_store %arg4[%c0_30, %c1_31, %c0_32, %c0_33], %58 {strides = array<i32>} : memref<1x4x8x128xf32, #tpu.memory_space<vmem>>, vector<1x1x8x128xf32>,
      %c0_34 = arith.constant 0 : index
      %c2 = arith.constant 2 : index
      %c0_35 = arith.constant 0 : index
      %c0_36 = arith.constant 0 : index
      %59 = vector.load %arg4[%c0_34, %c2, %c0_35, %c0_36] : memref<1x4x8x128xf32, #tpu.memory_space<vmem>>, vector<1x1x8x128xf32>
      %60 = vector.shape_cast %59 : vector<1x1x8x128xf32> to vector<8x128xf32>
      %61 = vector.shape_cast %33 : vector<32x128xf32> to vector<4x8x128xf32>
      %cst_37 = arith.constant dense<0.000000e+00> : vector<8x128xf32>
      %62 = vector.multi_reduction <add>, %61, %cst_37 [0] : vector<4x8x128xf32> to vector<8x128xf32>
      %63 = arith.addf %60, %62 : vector<8x128xf32>
      %c0_38 = arith.constant 0 : index
      %c2_39 = arith.constant 2 : index
      %c0_40 = arith.constant 0 : index
      %c0_41 = arith.constant 0 : index
      %64 = vector.load %arg4[%c0_38, %c2_39, %c0_40, %c0_41] : memref<1x4x8x128xf32, #tpu.memory_space<vmem>>, vector<1x1x8x128xf32>
      %65 = vector.shape_cast %64 : vector<1x1x8x128xf32> to vector<8x128xf32>
      %66 = vector.shape_cast %63 : vector<8x128xf32> to vector<1x1x8x128xf32>
      tpu.vector_store %arg4[%c0_38, %c2_39, %c0_40, %c0_41], %66 {strides = array<i32>} : memref<1x4x8x128xf32, #tpu.memory_space<vmem>>, vector<1x1x8x128xf32>,
      %c0_42 = arith.constant 0 : index
      %c3 = arith.constant 3 : index
      %c0_43 = arith.constant 0 : index
      %c0_44 = arith.constant 0 : index
      %67 = vector.load %arg4[%c0_42, %c3, %c0_43, %c0_44] : memref<1x4x8x128xf32, #tpu.memory_space<vmem>>, vector<1x1x8x128xf32>
      %68 = vector.shape_cast %67 : vector<1x1x8x128xf32> to vector<8x128xf32>
      %69 = vector.shape_cast %38 : vector<32x128xf32> to vector<4x8x128xf32>
      %cst_45 = arith.constant dense<0.000000e+00> : vector<8x128xf32>
      %70 = vector.multi_reduction <add>, %69, %cst_45 [0] : vector<4x8x128xf32> to vector<8x128xf32>
      %71 = arith.addf %68, %70 : vector<8x128xf32>
      %c0_46 = arith.constant 0 : index
      %c3_47 = arith.constant 3 : index
      %c0_48 = arith.constant 0 : index
      %c0_49 = arith.constant 0 : index
      %72 = vector.load %arg4[%c0_46, %c3_47, %c0_48, %c0_49] : memref<1x4x8x128xf32, #tpu.memory_space<vmem>>, vector<1x1x8x128xf32>
      %73 = vector.shape_cast %72 : vector<1x1x8x128xf32> to vector<8x128xf32>
      %74 = vector.shape_cast %71 : vector<8x128xf32> to vector<1x1x8x128xf32>
      tpu.vector_store %arg4[%c0_46, %c3_47, %c0_48, %c0_49], %74 {strides = array<i32>} : memref<1x4x8x128xf32, #tpu.memory_space<vmem>>, vector<1x1x8x128xf32>,
    } else {
    }
    %c4_i32_3 = arith.constant 4 : i32
    %10 = arith.cmpi slt, %5, %c4_i32_3 : i32
    %c32_i32_4 = arith.constant 32 : i32
    %11 = arith.addi %5, %c32_i32_4 : i32
    %c4_i32_5 = arith.constant 4 : i32
    %12 = arith.cmpi sgt, %11, %c4_i32_5 : i32
    %13 = arith.andi %10, %12 : i1
    %14 = arith.extui %13 : i1 to i32
    %c0_i32_6 = arith.constant 0 : i32
    %15 = arith.cmpi ne, %14, %c0_i32_6 : i32
    scf.if %15 {
      %c4_i32_7 = arith.constant 4 : i32
      %16 = arith.subi %c4_i32_7, %5 : i32
      %17 = tpu.iota {dimensions = array<i32: 0>} : vector<32x1xi32>
      %18 = vector.broadcast %16 : i32 to vector<32x1xi32>
      %19 = arith.cmpi slt, %17, %18 : vector<32x1xi32>
      %c0 = arith.constant 0 : index
      %c0_8 = arith.constant 0 : index
      %20 = vector.load %arg2[%c0, %c0_8] : memref<32x128xf32, #tpu.memory_space<vmem>>, vector<32x128xf32>
      %c0_9 = arith.constant 0 : index
      %c0_10 = arith.constant 0 : index
      %21 = vector.load %arg3[%c0_9, %c0_10] : memref<32x128xf32, #tpu.memory_space<vmem>>, vector<32x128xf32>
      %cst = arith.constant 1.000000e+00 : f32
      %22 = vector.broadcast %cst : f32 to vector<32x128xf32>
      %23 = arith.cmpf oeq, %21, %22 : vector<32x128xf32>
      %cst_11 = arith.constant 0.000000e+00 : f32
      %24 = vector.broadcast %cst_11 : f32 to vector<32x128xf32>
      %25 = arith.cmpf oeq, %21, %24 : vector<32x128xf32>
      %26 = vector.broadcast %19 : vector<32x1xi1> to vector<32x128xi1>
      %27 = arith.andi %26, %23 : vector<32x128xi1>
      %28 = vector.broadcast %19 : vector<32x1xi1> to vector<32x128xi1>
      %29 = arith.andi %28, %25 : vector<32x128xi1>
      %cst_12 = arith.constant 0.000000e+00 : f32
      %30 = vector.shape_cast %19 : vector<32x1xi1> to vector<32x1xi1>
      %31 = vector.broadcast %30 : vector<32x1xi1> to vector<32x128xi1>
      %32 = vector.broadcast %cst_12 : f32 to vector<32x128xf32>
      %33 = arith.select %31, %20, %32 : vector<32x128xi1>, vector<32x128xf32>
      %34 = math.absf %33 : vector<32x128xf32>
      %cst_13 = arith.constant 0.000000e+00 : f32
      %35 = vector.broadcast %cst_13 : f32 to vector<32x128xf32>
      %36 = arith.subf %35, %34 : vector<32x128xf32>
      %37 = math.exp %36 : vector<32x128xf32>
      %cst_14 = arith.constant 1.000000e+00 : f32
      %38 = vector.broadcast %cst_14 : f32 to vector<32x128xf32>
      %39 = arith.addf %38, %37 : vector<32x128xf32>
      %40 = math.log %39 : vector<32x128xf32>
      %cst_15 = arith.constant 0.000000e+00 : f32
      %41 = vector.broadcast %cst_15 : f32 to vector<32x128xf32>
      %42 = arith.minimumf %33, %41 : vector<32x128xf32>
      %43 = arith.subf %40, %42 : vector<32x128xf32>
      %cst_16 = arith.constant 0.000000e+00 : f32
      %44 = vector.broadcast %cst_16 : f32 to vector<32x128xf32>
      %45 = arith.select %27, %43, %44 : vector<32x128xi1>, vector<32x128xf32>
      %cst_17 = arith.constant 0.000000e+00 : f32
      %46 = vector.broadcast %cst_17 : f32 to vector<32x128xf32>
      %47 = arith.maximumf %33, %46 : vector<32x128xf32>
      %48 = arith.addf %40, %47 : vector<32x128xf32>
      %cst_18 = arith.constant 0.000000e+00 : f32
      %49 = vector.broadcast %cst_18 : f32 to vector<32x128xf32>
      %50 = arith.select %29, %48, %49 : vector<32x128xi1>, vector<32x128xf32>
      %c0_19 = arith.constant 0 : index
      %c0_20 = arith.constant 0 : index
      %c0_21 = arith.constant 0 : index
      %c0_22 = arith.constant 0 : index
      %51 = vector.load %arg4[%c0_19, %c0_20, %c0_21, %c0_22] : memref<1x4x8x128xf32, #tpu.memory_space<vmem>>, vector<1x1x8x128xf32>
      %52 = vector.shape_cast %51 : vector<1x1x8x128xf32> to vector<8x128xf32>
      %53 = arith.extui %27 : vector<32x128xi1> to vector<32x128xi32>
      %54 = arith.sitofp %53 : vector<32x128xi32> to vector<32x128xf32>
      %55 = vector.shape_cast %54 : vector<32x128xf32> to vector<4x8x128xf32>
      %cst_23 = arith.constant dense<0.000000e+00> : vector<8x128xf32>
      %56 = vector.multi_reduction <add>, %55, %cst_23 [0] : vector<4x8x128xf32> to vector<8x128xf32>
      %57 = arith.addf %52, %56 : vector<8x128xf32>
      %c0_24 = arith.constant 0 : index
      %c0_25 = arith.constant 0 : index
      %c0_26 = arith.constant 0 : index
      %c0_27 = arith.constant 0 : index
      %58 = vector.load %arg4[%c0_24, %c0_25, %c0_26, %c0_27] : memref<1x4x8x128xf32, #tpu.memory_space<vmem>>, vector<1x1x8x128xf32>
      %59 = vector.shape_cast %58 : vector<1x1x8x128xf32> to vector<8x128xf32>
      %60 = vector.shape_cast %57 : vector<8x128xf32> to vector<1x1x8x128xf32>
      tpu.vector_store %arg4[%c0_24, %c0_25, %c0_26, %c0_27], %60 {strides = array<i32>} : memref<1x4x8x128xf32, #tpu.memory_space<vmem>>, vector<1x1x8x128xf32>,
      %c0_28 = arith.constant 0 : index
      %c1 = arith.constant 1 : index
      %c0_29 = arith.constant 0 : index
      %c0_30 = arith.constant 0 : index
      %61 = vector.load %arg4[%c0_28, %c1, %c0_29, %c0_30] : memref<1x4x8x128xf32, #tpu.memory_space<vmem>>, vector<1x1x8x128xf32>
      %62 = vector.shape_cast %61 : vector<1x1x8x128xf32> to vector<8x128xf32>
      %63 = arith.extui %29 : vector<32x128xi1> to vector<32x128xi32>
      %64 = arith.sitofp %63 : vector<32x128xi32> to vector<32x128xf32>
      %65 = vector.shape_cast %64 : vector<32x128xf32> to vector<4x8x128xf32>
      %cst_31 = arith.constant dense<0.000000e+00> : vector<8x128xf32>
      %66 = vector.multi_reduction <add>, %65, %cst_31 [0] : vector<4x8x128xf32> to vector<8x128xf32>
      %67 = arith.addf %62, %66 : vector<8x128xf32>
      %c0_32 = arith.constant 0 : index
      %c1_33 = arith.constant 1 : index
      %c0_34 = arith.constant 0 : index
      %c0_35 = arith.constant 0 : index
      %68 = vector.load %arg4[%c0_32, %c1_33, %c0_34, %c0_35] : memref<1x4x8x128xf32, #tpu.memory_space<vmem>>, vector<1x1x8x128xf32>
      %69 = vector.shape_cast %68 : vector<1x1x8x128xf32> to vector<8x128xf32>
      %70 = vector.shape_cast %67 : vector<8x128xf32> to vector<1x1x8x128xf32>
      tpu.vector_store %arg4[%c0_32, %c1_33, %c0_34, %c0_35], %70 {strides = array<i32>} : memref<1x4x8x128xf32, #tpu.memory_space<vmem>>, vector<1x1x8x128xf32>,
      %c0_36 = arith.constant 0 : index
      %c2 = arith.constant 2 : index
      %c0_37 = arith.constant 0 : index
      %c0_38 = arith.constant 0 : index
      %71 = vector.load %arg4[%c0_36, %c2, %c0_37, %c0_38] : memref<1x4x8x128xf32, #tpu.memory_space<vmem>>, vector<1x1x8x128xf32>
      %72 = vector.shape_cast %71 : vector<1x1x8x128xf32> to vector<8x128xf32>
      %73 = vector.shape_cast %45 : vector<32x128xf32> to vector<4x8x128xf32>
      %cst_39 = arith.constant dense<0.000000e+00> : vector<8x128xf32>
      %74 = vector.multi_reduction <add>, %73, %cst_39 [0] : vector<4x8x128xf32> to vector<8x128xf32>
      %75 = arith.addf %72, %74 : vector<8x128xf32>
      %c0_40 = arith.constant 0 : index
      %c2_41 = arith.constant 2 : index
      %c0_42 = arith.constant 0 : index
      %c0_43 = arith.constant 0 : index
      %76 = vector.load %arg4[%c0_40, %c2_41, %c0_42, %c0_43] : memref<1x4x8x128xf32, #tpu.memory_space<vmem>>, vector<1x1x8x128xf32>
      %77 = vector.shape_cast %76 : vector<1x1x8x128xf32> to vector<8x128xf32>
      %78 = vector.shape_cast %75 : vector<8x128xf32> to vector<1x1x8x128xf32>
      tpu.vector_store %arg4[%c0_40, %c2_41, %c0_42, %c0_43], %78 {strides = array<i32>} : memref<1x4x8x128xf32, #tpu.memory_space<vmem>>, vector<1x1x8x128xf32>,
      %c0_44 = arith.constant 0 : index
      %c3 = arith.constant 3 : index
      %c0_45 = arith.constant 0 : index
      %c0_46 = arith.constant 0 : index
      %79 = vector.load %arg4[%c0_44, %c3, %c0_45, %c0_46] : memref<1x4x8x128xf32, #tpu.memory_space<vmem>>, vector<1x1x8x128xf32>
      %80 = vector.shape_cast %79 : vector<1x1x8x128xf32> to vector<8x128xf32>
      %81 = vector.shape_cast %50 : vector<32x128xf32> to vector<4x8x128xf32>
      %cst_47 = arith.constant dense<0.000000e+00> : vector<8x128xf32>
      %82 = vector.multi_reduction <add>, %81, %cst_47 [0] : vector<4x8x128xf32> to vector<8x128xf32>
      %83 = arith.addf %80, %82 : vector<8x128xf32>
      %c0_48 = arith.constant 0 : index
      %c3_49 = arith.constant 3 : index
      %c0_50 = arith.constant 0 : index
      %c0_51 = arith.constant 0 : index
      %84 = vector.load %arg4[%c0_48, %c3_49, %c0_50, %c0_51] : memref<1x4x8x128xf32, #tpu.memory_space<vmem>>, vector<1x1x8x128xf32>
      %85 = vector.shape_cast %84 : vector<1x1x8x128xf32> to vector<8x128xf32>
      %86 = vector.shape_cast %83 : vector<8x128xf32> to vector<1x1x8x128xf32>
      tpu.vector_store %arg4[%c0_48, %c3_49, %c0_50, %c0_51], %86 {strides = array<i32>} : memref<1x4x8x128xf32, #tpu.memory_space<vmem>>, vector<1x1x8x128xf32>,
    } else {
    }
    return
  }
  func.func @transform_0(%arg0: i32, %arg1: i32) -> (i32, i32) {
    %c1_i32 = arith.constant 1 : i32
    %0 = arith.muli %arg0, %c1_i32 : i32
    %1 = arith.addi %0, %arg1 : i32
    %c0_i32 = arith.constant 0 : i32
    %c0_i32_0 = arith.constant 0 : i32
    return %1, %c0_i32 : i32, i32
  }
  func.func @transform_1(%arg0: i32, %arg1: i32) -> (i32, i32) {
    %c1_i32 = arith.constant 1 : i32
    %0 = arith.muli %arg0, %c1_i32 : i32
    %1 = arith.addi %0, %arg1 : i32
    %c0_i32 = arith.constant 0 : i32
    %c0_i32_0 = arith.constant 0 : i32
    return %1, %c0_i32 : i32, i32
  }
  func.func @transform_2(%arg0: i32, %arg1: i32) -> (i32, i32, i32, i32) {
    %c0_i32 = arith.constant 0 : i32
    %c0_i32_0 = arith.constant 0 : i32
    %c0_i32_1 = arith.constant 0 : i32
    %c0_i32_2 = arith.constant 0 : i32
    return %arg0, %c0_i32, %c0_i32_0, %c0_i32_1 : i32, i32, i32, i32
  }
}

</mosaic_0001>

<bundles_post_ra>
// kernel: criterion_loss.1
= control target key start
LH: loop header
LB: loop body
LE: loop exit
PB: predicated region body
PF: predicated region fallthrough
CT: control target
= control target key end

     0   :  { %v208_v0 = vlaneseq  ;;  %v392_v7 = vmov 0.0   ;;  %s442_s0 = inlined_call_operand.vmem [shape: f32[4,128], index: 0, kind: input, shape index: {}]   ;;  %s443_s1 = inlined_call_operand.vmem [shape: f32[4,128], index: 1, kind: input, shape index: {}]   ;;  %s444_s2 = inlined_call_operand.vmem [shape: f32[1,4,8,128], index: 2, kind: output, shape index: {}]  }
   0x1   :  { %v222_v1 = vld [vmem:[%s443_s1] sm:$0xff] }
   0x2   :  { %v209_v2 = vshrl.u32 %v208_v0, 7  ;;  %v218_v3 = vld [vmem:[%s442_s0] sm:$0xff]  ;;  %vm226_vm0 = vcmp.eq.f32.partialorder %v222_v1, 1.0  ;;  %vm230_vm1 = vcmp.eq.f32.partialorder %v222_v1, 0.0 }
   0x4   :  { %vm214_vm2 = vcmp.lt.s32.totalorder %v209_v2, 4 }
   0x5   :  { %vm414_vm3 = vmand %vm214_vm2, %vm226_vm0  ;;  %v250_v5 = vsel %vm214_vm2, %v218_v3, 0.0 }
   0x6   :  { %v254_v6 = vand.u32 2147483647, %v250_v5  ;;  %v379_v8 = vsel %vm414_vm3, 1.0, %v392_v7  ;;  %vm420_vm4 = vmand %vm214_vm2, %vm230_vm1  ;;  %v282_v15 = vmin.f32 %v250_v5, 0.0  ;;  %v294_v16 = vmax.f32 %v250_v5, 0.0 }
   0x7   :  { %v381_v10 = vsel %vm420_vm4, 1.0, %v392_v7  ;;  %319 = vst [vmem:[%s444_s2] sm:$0xff] %v379_v8 }
   0x8   :  { %v258_v11 = vsub.f32 0.0, %v254_v6  ;;  %382 = vst [vmem:[%s444_s2 + $0x8] sm:$0xff] %v381_v10 }
   0xa   :  { %v262_v12 = vmul.f32 1.442695, %v258_v11 }
   0xc   :  { %388 = vpow2.f32 %v262_v12 }
  0x12   :  { %v389_v13 = vpop.eup %388 }
  0x13   :  { %v270_v14 = vadd.f32 1.0, %v389_v13 }
  0x15   :  { %390 = vlog2.f32 %v270_v14 }
  0x1b   :  { %v391_v17 = vpop.eup %390 }
  0x1c   :  { %v275_v18 = vmul.f32 0.6931472, %v391_v17 }
  0x1e   :  { %v286_v19 = vsub.f32 %v275_v18, %v282_v15  ;;  %v298_v20 = vadd.f32 %v294_v16, %v275_v18 }
  0x20   :  { %v290_v21 = vsel %vm414_vm3, %v286_v19, 0.0  ;;  %v302_v22 = vsel %vm420_vm4, %v298_v20, 0.0 }
  0x21   :  { %384 = vst [vmem:[%s444_s2 + $0x10] sm:$0xff] %v290_v21 }
  0x22   :  { %386 = vst [vmem:[%s444_s2 + $0x18] sm:$0xff] %v302_v22 }

</bundles_post_ra>
